<compile_context>
chip_gen: v5e
topology: v5e:2x2
jax: 0.10.0
libtpu: 0.0.40
codegen_flags: <defaults>
</compile_context>

<pallas_src>
from functools import partial

import jax
import jax.numpy as jnp
from jax.experimental import pallas as pl
from jax.experimental.pallas import tpu as pltpu

FEAT_DIM = 512          # backbone feature width consumed by the head
NUM_CLASSES = 10
OUT_PAD = 128           # lane-dense padded head width
C_PAD = 128             # lane-dense padded channel width for pooled features

# Keep the double-buffered f32 x tile within this VMEM budget (v7x-safe).
_X_TILE_VMEM_BUDGET = 16 * 1024 * 1024


def _make_kernel(C, HW):
    inv_hw = 1.0 / HW

    def kernel(x_ref, wf_ref, wg_ref, bg_ref, out_ref):
        # x_ref : [TB, C*HW]      f32   input tile (spatial flattened into lanes)
        # wf_ref: [C_PAD, 512]    bf16  backbone projection (rows >= C are zero)
        # wg_ref: [512, OUT_PAD]  bf16  head weight (cols >= num_classes are zero)
        # bg_ref: [1, OUT_PAD]    f32   head bias (cols >= num_classes are zero)
        # out_ref:[TB, OUT_PAD]   f32   padded logits
        tb = out_ref.shape[0]

        # Global average pool in f32: per-channel 128-aligned lane-chunk sums
        # (XLU reduce), each placed into lane c of a lane-dense [TB, C_PAD]
        # MXU operand via an iota mask.  No HWx FLOP blowup, no wide weight.
        lane = jax.lax.broadcasted_iota(jnp.int32, (tb, C_PAD), 1)
        pooled = jnp.zeros((tb, C_PAD), jnp.float32)
        for c in range(C):
            s = jnp.sum(x_ref[:, c * HW:(c + 1) * HW], axis=-1, keepdims=True)
            pooled = pooled + jnp.where(lane == c, s * inv_hw, 0.0)

        # Stand-in backbone projection + ReLU (bf16 MXU inputs, f32 accumulate).
        h = jnp.dot(pooled.astype(jnp.bfloat16), wf_ref[...],
                    preferred_element_type=jnp.float32)
        h = jnp.maximum(h, 0.0)

        # Linear head g: h @ W + b on a lane-dense 128-wide padded output.
        logits = jnp.dot(h.astype(jnp.bfloat16), wg_ref[...],
                         preferred_element_type=jnp.float32)
        out_ref[...] = logits + bg_ref[...]

    return kernel


def _choose_batch_tiling(B, block_b, K):
    """Pick (tile_rows, n_tiles).

    tile_rows is a multiple of 8 (or == B for tiny B), capped by a VMEM budget,
    with an even number of >= 2 tiles whenever B > 8 so both v7x TensorCores
    get balanced work and padding waste at the ragged tail stays minimal.
    """
    max_tb = max(8, (_X_TILE_VMEM_BUDGET // (2 * K * 4)) // 8 * 8)
    block_b = max(8, min(block_b, max_tb))
    if B <= 8:
        return B, 1                         # single full-extent tile (tb == B)
    n_tiles = max(2, pl.cdiv(B, block_b))
    if n_tiles % 2:
        n_tiles += 1                        # even tile count -> balanced megacore split
    tb = min(block_b, (pl.cdiv(B, n_tiles) + 7) // 8 * 8)
    n_tiles = pl.cdiv(B, tb)                # every tile keeps >= 1 valid row
    return tb, n_tiles


def _vmem_limit_bytes(tb, K):
    x_bytes = 2 * tb * K * 4                     # double-buffered f32 input tile
    out_bytes = 2 * tb * OUT_PAD * 4             # double-buffered f32 output tile
    w_bytes = 2 * (C_PAD * FEAT_DIM * 2 + FEAT_DIM * OUT_PAD * 2 + 8 * OUT_PAD * 4)
    inter_bytes = tb * (6 * FEAT_DIM + 6 * C_PAD + 4 * OUT_PAD)  # h/pooled/logits temps
    need = x_bytes + out_bytes + w_bytes + inter_bytes
    return int(min(max(need + need // 4 + (2 << 20), 8 << 20), 48 << 20))


def prepare_linear_head_params(w_feat, w_g, b_g):
    """One-time parameter preprocessing (hoisted out of the per-call path).

    Pads to lane-dense MXU-friendly shapes and casts matmul operands to bf16
    once, so no per-call HBM pass touches the parameters.
    """
    C = w_feat.shape[0]
    n_classes = w_g.shape[1]
    if C > C_PAD:
        raise NotImplementedError("stand-in backbone supports C <= 128 channels")
    if n_classes > OUT_PAD:
        raise NotImplementedError("head wider than 128 classes not supported")
    wf_pad = jnp.zeros((C_PAD, FEAT_DIM), jnp.bfloat16)
    wf_pad = wf_pad.at[:C, :].set(w_feat.astype(jnp.bfloat16))
    wg_pad = jnp.zeros((FEAT_DIM, OUT_PAD), jnp.bfloat16)
    wg_pad = wg_pad.at[:, :n_classes].set(w_g.astype(jnp.bfloat16))
    bg_pad = jnp.zeros((1, OUT_PAD), jnp.float32)
    bg_pad = bg_pad.at[:, :n_classes].set(b_g.astype(jnp.float32)[None, :])
    return wf_pad, wg_pad, bg_pad


@partial(jax.jit, static_argnames=("n_classes", "block_b"))
def _linear_head_forward(x, wf_pad, wg_pad, bg_pad, *, n_classes, block_b):
    B, C, H, W = x.shape
    HW = H * W
    K = C * HW
    x2d = x.reshape(B, K)                        # contiguous, free under jit

    tb, n_tiles = _choose_batch_tiling(B, block_b, K)

    out_padded = pl.pallas_call(
        _make_kernel(C, HW),
        out_shape=jax.ShapeDtypeStruct((B, OUT_PAD), jnp.float32),
        grid_spec=pltpu.PrefetchScalarGridSpec(
            num_scalar_prefetch=0,
            grid=(n_tiles,),
            in_specs=[
                # f32 x tile: DMA'd straight from HBM (no wrapper-side cast
                # pass); the bf16 cast happens on the tiny pooled operand.
                pl.BlockSpec((tb, K), lambda i: (i, 0)),
                # VMEM-resident parameters (constant index maps).
                pl.BlockSpec((C_PAD, FEAT_DIM), lambda i: (0, 0)),
                pl.BlockSpec((FEAT_DIM, OUT_PAD), lambda i: (0, 0)),
                pl.BlockSpec((1, OUT_PAD), lambda i: (0, 0)),
            ],
            out_specs=pl.BlockSpec((tb, OUT_PAD), lambda i: (i, 0)),
        ),
        compiler_params=pltpu.CompilerParams(
            dimension_semantics=("parallel",),   # batch tiles are independent
            vmem_limit_bytes=_vmem_limit_bytes(tb, K),
        ),
    )(x2d, wf_pad, wg_pad, bg_pad)

    return out_padded[:, :n_classes]


def linear_head_model(x, w_feat, w_g, b_g, *, block_b=1024):
    """x: [B, C, H, W] f32 -> logits [B, num_classes] f32.

    Convenience single-call API; in real use prepare_linear_head_params is
    called once and the result cached (the hot path is _linear_head_forward).
    """
    params = prepare_linear_head_params(w_feat, w_g, b_g)
    return _linear_head_forward(x, *params, n_classes=w_g.shape[1],
                                block_b=block_b)


if __name__ == "__main__":
    key = jax.random.PRNGKey(0)
    k_x, k_wf, k_wg, k_bg = jax.random.split(key, 4)

    B, C, H, W = 2, 4, 16, 16
    HW = H * W
    x = jax.random.normal(k_x, (B, C, H, W), dtype=jnp.float32)

    # Deterministic synthetic parameters (no checkpoint load).
    w_feat = jax.random.normal(k_wf, (C, FEAT_DIM), dtype=jnp.float32) * 0.05
    w_g = jax.random.normal(k_wg, (FEAT_DIM, NUM_CLASSES), dtype=jnp.float32) * 0.05
    b_g = jax.random.normal(k_bg, (NUM_CLASSES,), dtype=jnp.float32) * 0.05

    # Parameter prep hoisted out of the per-call path (done once).
    params = prepare_linear_head_params(w_feat, w_g, b_g)
    out = _linear_head_forward(x, *params, n_classes=NUM_CLASSES, block_b=1024)
    out = jax.block_until_ready(out)
    assert out.shape == (B, NUM_CLASSES)

    # Reference 1: same compute path as the kernel (f32 pool, bf16 matmuls with
    # f32 accumulation) -- tight check.
    pooled = jnp.mean(x.reshape(B, C, HW), axis=-1)                       # f32
    h_bf = jnp.maximum(
        jnp.dot(pooled.astype(jnp.bfloat16), w_feat.astype(jnp.bfloat16),
                preferred_element_type=jnp.float32), 0.0)
    ref_bf = jnp.dot(h_bf.astype(jnp.bfloat16), w_g.astype(jnp.bfloat16),
                     preferred_element_type=jnp.float32) + b_g
    assert jnp.allclose(out, ref_bf, atol=1e-4, rtol=1e-3)

    # Reference 2: f32 semantics of the stand-in module (loose check).
    h_ref = jnp.maximum(pooled @ w_feat, 0.0)
    ref = h_ref @ w_g + b_g
    assert jnp.allclose(out, ref, atol=2e-3, rtol=2e-2)

    print("KERNEL_OK")
</pallas_src>

<mosaic_0001>
module attributes {stable_mosaic.version = 11 : i64} {
  func.func @kernel(%arg0: i32, %arg1: memref<2x1024xf32, #tpu.memory_space<vmem>>, %arg2: memref<128x512xbf16, #tpu.memory_space<vmem>>, %arg3: memref<512x128xbf16, #tpu.memory_space<vmem>>, %arg4: memref<1x128xf32, #tpu.memory_space<vmem>>, %arg5: memref<2x128xf32, #tpu.memory_space<vmem>>) attributes {dimension_semantics = [#tpu.dimension_semantics<parallel>], iteration_bounds = array<i64: 1>, scalar_prefetch = 0 : i64, scratch_operands = 0 : i64, tpu.core_type = #tpu.core_type<tc>, window_params = [{transform_indices = @transform_0, window_bounds = array<i64: 2, 1024>}, {pipeline_mode = #tpu.pipeline_mode<synchronous>, transform_indices = @transform_1, window_bounds = array<i64: 128, 512>}, {pipeline_mode = #tpu.pipeline_mode<synchronous>, transform_indices = @transform_2, window_bounds = array<i64: 512, 128>}, {pipeline_mode = #tpu.pipeline_mode<synchronous>, transform_indices = @transform_3, window_bounds = array<i64: 1, 128>}, {transform_indices = @transform_4, window_bounds = array<i64: 2, 128>}]} {
    %0 = tpu.iota {dimensions = array<i32: 1>} : vector<2x128xi32>
    %cst = arith.constant 0.000000e+00 : f32
    %1 = vector.broadcast %cst : f32 to vector<2x128xf32>
    %c0 = arith.constant 0 : index
    %c0_0 = arith.constant 0 : index
    %2 = vector.load %arg1[%c0, %c0_0] : memref<2x1024xf32, #tpu.memory_space<vmem>>, vector<2x256xf32>
    %cst_1 = arith.constant dense<0.000000e+00> : vector<2xf32>
    %3 = vector.multi_reduction <add>, %2, %cst_1 [1] : vector<2x256xf32> to vector<2xf32>
    %4 = vector.shape_cast %3 : vector<2xf32> to vector<2x1xf32>
    %c0_i32 = arith.constant 0 : i32
    %5 = vector.broadcast %c0_i32 : i32 to vector<2x128xi32>
    %6 = arith.cmpi eq, %0, %5 : vector<2x128xi32>
    %cst_2 = arith.constant 3.906250e-03 : f32
    %7 = vector.broadcast %cst_2 : f32 to vector<2x1xf32>
    %8 = arith.mulf %4, %7 : vector<2x1xf32>
    %cst_3 = arith.constant 0.000000e+00 : f32
    %9 = vector.shape_cast %8 : vector<2x1xf32> to vector<2x1xf32>
    %10 = vector.broadcast %9 : vector<2x1xf32> to vector<2x128xf32>
    %11 = vector.broadcast %cst_3 : f32 to vector<2x128xf32>
    %12 = arith.select %6, %10, %11 : vector<2x128xi1>, vector<2x128xf32>
    %13 = arith.addf %1, %12 : vector<2x128xf32>
    %c0_4 = arith.constant 0 : index
    %c256 = arith.constant 256 : index
    %14 = vector.load %arg1[%c0_4, %c256] : memref<2x1024xf32, #tpu.memory_space<vmem>>, vector<2x256xf32>
    %cst_5 = arith.constant dense<0.000000e+00> : vector<2xf32>
    %15 = vector.multi_reduction <add>, %14, %cst_5 [1] : vector<2x256xf32> to vector<2xf32>
    %16 = vector.shape_cast %15 : vector<2xf32> to vector<2x1xf32>
    %c1_i32 = arith.constant 1 : i32
    %17 = vector.broadcast %c1_i32 : i32 to vector<2x128xi32>
    %18 = arith.cmpi eq, %0, %17 : vector<2x128xi32>
    %cst_6 = arith.constant 3.906250e-03 : f32
    %19 = vector.broadcast %cst_6 : f32 to vector<2x1xf32>
    %20 = arith.mulf %16, %19 : vector<2x1xf32>
    %cst_7 = arith.constant 0.000000e+00 : f32
    %21 = vector.shape_cast %20 : vector<2x1xf32> to vector<2x1xf32>
    %22 = vector.broadcast %21 : vector<2x1xf32> to vector<2x128xf32>
    %23 = vector.broadcast %cst_7 : f32 to vector<2x128xf32>
    %24 = arith.select %18, %22, %23 : vector<2x128xi1>, vector<2x128xf32>
    %25 = arith.addf %13, %24 : vector<2x128xf32>
    %c0_8 = arith.constant 0 : index
    %c512 = arith.constant 512 : index
    %26 = vector.load %arg1[%c0_8, %c512] : memref<2x1024xf32, #tpu.memory_space<vmem>>, vector<2x256xf32>
    %cst_9 = arith.constant dense<0.000000e+00> : vector<2xf32>
    %27 = vector.multi_reduction <add>, %26, %cst_9 [1] : vector<2x256xf32> to vector<2xf32>
    %28 = vector.shape_cast %27 : vector<2xf32> to vector<2x1xf32>
    %c2_i32 = arith.constant 2 : i32
    %29 = vector.broadcast %c2_i32 : i32 to vector<2x128xi32>
    %30 = arith.cmpi eq, %0, %29 : vector<2x128xi32>
    %cst_10 = arith.constant 3.906250e-03 : f32
    %31 = vector.broadcast %cst_10 : f32 to vector<2x1xf32>
    %32 = arith.mulf %28, %31 : vector<2x1xf32>
    %cst_11 = arith.constant 0.000000e+00 : f32
    %33 = vector.shape_cast %32 : vector<2x1xf32> to vector<2x1xf32>
    %34 = vector.broadcast %33 : vector<2x1xf32> to vector<2x128xf32>
    %35 = vector.broadcast %cst_11 : f32 to vector<2x128xf32>
    %36 = arith.select %30, %34, %35 : vector<2x128xi1>, vector<2x128xf32>
    %37 = arith.addf %25, %36 : vector<2x128xf32>
    %c0_12 = arith.constant 0 : index
    %c768 = arith.constant 768 : index
    %38 = vector.load %arg1[%c0_12, %c768] : memref<2x1024xf32, #tpu.memory_space<vmem>>, vector<2x256xf32>
    %cst_13 = arith.constant dense<0.000000e+00> : vector<2xf32>
    %39 = vector.multi_reduction <add>, %38, %cst_13 [1] : vector<2x256xf32> to vector<2xf32>
    %40 = vector.shape_cast %39 : vector<2xf32> to vector<2x1xf32>
    %c3_i32 = arith.constant 3 : i32
    %41 = vector.broadcast %c3_i32 : i32 to vector<2x128xi32>
    %42 = arith.cmpi eq, %0, %41 : vector<2x128xi32>
    %cst_14 = arith.constant 3.906250e-03 : f32
    %43 = vector.broadcast %cst_14 : f32 to vector<2x1xf32>
    %44 = arith.mulf %40, %43 : vector<2x1xf32>
    %cst_15 = arith.constant 0.000000e+00 : f32
    %45 = vector.shape_cast %44 : vector<2x1xf32> to vector<2x1xf32>
    %46 = vector.broadcast %45 : vector<2x1xf32> to vector<2x128xf32>
    %47 = vector.broadcast %cst_15 : f32 to vector<2x128xf32>
    %48 = arith.select %42, %46, %47 : vector<2x128xi1>, vector<2x128xf32>
    %49 = arith.addf %37, %48 : vector<2x128xf32>
    %50 = arith.truncf %49 : vector<2x128xf32> to vector<2x128xbf16>
    %c0_16 = arith.constant 0 : index
    %c0_17 = arith.constant 0 : index
    %51 = vector.load %arg2[%c0_16, %c0_17] : memref<128x512xbf16, #tpu.memory_space<vmem>>, vector<128x512xbf16>
    %cst_18 = arith.constant dense<0.000000e+00> : vector<2x512xf32>
    %52 = tpu.matmul %50, %51, %cst_18 {dimension_numbers = #tpu.dot_dimension_numbers<[1], [0], [0], [1], [0, 0, 1, 1], [], []>} : vector<2x128xbf16>, vector<128x512xbf16>, vector<2x512xf32> -> vector<2x512xf32>
    %cst_19 = arith.constant 0.000000e+00 : f32
    %53 = vector.broadcast %cst_19 : f32 to vector<2x512xf32>
    %54 = arith.maximumf %52, %53 : vector<2x512xf32>
    %55 = arith.truncf %54 : vector<2x512xf32> to vector<2x512xbf16>
    %c0_20 = arith.constant 0 : index
    %c0_21 = arith.constant 0 : index
    %56 = vector.load %arg3[%c0_20, %c0_21] : memref<512x128xbf16, #tpu.memory_space<vmem>>, vector<512x128xbf16>
    %cst_22 = arith.constant dense<0.000000e+00> : vector<2x128xf32>
    %57 = tpu.matmul %55, %56, %cst_22 {dimension_numbers = #tpu.dot_dimension_numbers<[1], [0], [0], [1], [0, 0, 1, 1], [], []>} : vector<2x512xbf16>, vector<512x128xbf16>, vector<2x128xf32> -> vector<2x128xf32>
    %c0_23 = arith.constant 0 : index
    %c0_24 = arith.constant 0 : index
    %58 = vector.load %arg4[%c0_23, %c0_24] : memref<1x128xf32, #tpu.memory_space<vmem>>, vector<1x128xf32>
    %59 = vector.broadcast %58 : vector<1x128xf32> to vector<2x128xf32>
    %60 = arith.addf %57, %59 : vector<2x128xf32>
    %c0_25 = arith.constant 0 : index
    %c0_26 = arith.constant 0 : index
    %61 = vector.load %arg5[%c0_25, %c0_26] : memref<2x128xf32, #tpu.memory_space<vmem>>, vector<2x128xf32>
    tpu.vector_store %arg5[%c0_25, %c0_26], %60 {strides = array<i32>} : memref<2x128xf32, #tpu.memory_space<vmem>>, vector<2x128xf32>,
    return
  }
  func.func @transform_0(%arg0: i32) -> (i32, i32) {
    %c0_i32 = arith.constant 0 : i32
    %c0_i32_0 = arith.constant 0 : i32
    return %arg0, %c0_i32 : i32, i32
  }
  func.func @transform_1(%arg0: i32) -> (i32, i32) {
    %c0_i32 = arith.constant 0 : i32
    %c0_i32_0 = arith.constant 0 : i32
    %c0_i32_1 = arith.constant 0 : i32
    return %c0_i32, %c0_i32_0 : i32, i32
  }
  func.func @transform_2(%arg0: i32) -> (i32, i32) {
    %c0_i32 = arith.constant 0 : i32
    %c0_i32_0 = arith.constant 0 : i32
    %c0_i32_1 = arith.constant 0 : i32
    return %c0_i32, %c0_i32_0 : i32, i32
  }
  func.func @transform_3(%arg0: i32) -> (i32, i32) {
    %c0_i32 = arith.constant 0 : i32
    %c0_i32_0 = arith.constant 0 : i32
    %c0_i32_1 = arith.constant 0 : i32
    return %c0_i32, %c0_i32_0 : i32, i32
  }
  func.func @transform_4(%arg0: i32) -> (i32, i32) {
    %c0_i32 = arith.constant 0 : i32
    %c0_i32_0 = arith.constant 0 : i32
    return %arg0, %c0_i32 : i32, i32
  }
}

</mosaic_0001>

<bundles_post_ra>
// kernel: _linear_head_forward.1
= control target key start
LH: loop header
LB: loop body
LE: loop exit
PB: predicated region body
PF: predicated region fallthrough
CT: control target
= control target key end

     0   :  { %9 = vsyncpa [#allocation3], 0  ;;  %s1171_s0 = inlined_call_operand.vmem [shape: f32[2,1024], index: 0, kind: input, shape index: {}]   ;;  %s1172_s1 = inlined_call_operand.hbm [shape: bf16[128,512], index: 1, kind: input, shape index: {}]   ;;  %s1173_s2 = inlined_call_operand.hbm [shape: bf16[512,128], index: 2, kind: input, shape index: {}]   ;;  %s1174_s3 = inlined_call_operand.vmem [shape: f32[1,128], index: 3, kind: input, shape index: {}]   ;;  %s1175_s4 = inlined_call_operand.hbm [shape: f32[2,128], index: 4, kind: output, shape index: {}]  }
   0x1   :  { %10 = vsyncpa [#allocation6], 0 }
   0x2   :  { %11 = vsyncpa [#allocation4], 0  ;;  %s18_s17 = sshll.u32 %s1172_s1, 4  ;;  %s1107_s18 = smov [#allocation2]   ;;  %s19_s17 = int_to_ptr.hbm [resolvable:$true] %s18_s17 }
   0x3   :  { %s20_s19 = sshll.u32 %s1107_s18, 4  ;;  %s31_s22 = sshll.u32 %s1173_s2, 4  ;;  %s21_s19 = int_to_ptr.vmem [resolvable:$true] %s20_s19  ;;  %s32_s22 = int_to_ptr.hbm [resolvable:$true] %s31_s22 }
   0x4   :  { %s1108_s23 = smov 256   ;;  %s1109_s24 = smov 16  }
   0x5   :  { %26 = dma.hbm_to_vmem [thread:$0]  %s19_s17, 4096, %s21_s19, [#allocation3], %s1108_s23, %s1108_s23, %s1109_s24  }
   0x6   :  { %s1110_s25 = smov [#allocation5]   ;;  %s1111_s27 = smov 64  }
   0x7   :  { %s33_s26 = sshll.u32 %s1110_s25, 4  ;;  %s1112_s28 = smov 4   ;;  %s34_s26 = int_to_ptr.vmem [resolvable:$true] %s33_s26 }
   0x8   :  { %39 = dma.hbm_to_vmem [thread:$0]  %s32_s22, 4096, %s34_s26, [#allocation6], %s1111_s27, %s1111_s27, %s1112_s28  }
   0x9   :  { %1101 = dma.done.wait [#allocation3], 4096  }
   0xa   :  { %1102 = vsyncadd [#allocation3], 4294963200 }
   0xb   :  { %1103 = dma.done.wait [#allocation6], 4096  }
   0xc   :  { %1104 = vsyncadd [#allocation6], 4294963200  ;;  %v52_v0 = vld [vmem:[%s1171_s0] sm:$0xf]  ;;  %vm59_vm0 = vcmask 1041408   ;;  %s1113_s10 = smov [#allocation7]  }
   0xd   :  { %54 = vst [vmem:[#allocation1] ss:$4 sm:$0xff] %v52_v0  ;;  %v815_v1 = vld [vmem:[#allocation2 + $0xe0] sm:$0xf]  ;;  %v987_v2 = vld [vmem:[#allocation2 + $0xec] sm:$0xf0] }
   0xe   :  { %v985_v3 = vld [vmem:[#allocation2 + $0xe4] sm:$0xf]  ;;  %v816_v4 = vor.u32 %v987_v2, %v815_v1  ;;  %v817_v5 = vld [vmem:[#allocation2 + $0xf0] sm:$0xf0]  ;;  %v823_v6 = vld [vmem:[#allocation2 + $0xe8] sm:$0xf] }
   0xf   :  { %v988_v7 = vld [vmem:[#allocation2 + $0xf4] sm:$0xf0]  ;;  %v69_v8 = vld [vmem:[%s1171_s0 + $0x4] sm:$0xf]  ;;  %v820_v9 = vor.u32 %v985_v3, %v817_v5  ;;  %v986_v11 = vld [vmem:[#allocation2 + $0xec] sm:$0xf] }
  0x10   :  { %v824_v10 = vor.u32 %v988_v7, %v823_v6  ;;  %v825_v12 = vld [vmem:[#allocation2 + $0xf8] sm:$0xf0]  ;;  %310 = vmatpush.bf16.msra.mxu0 %v816_v4  ;;  %v85_v19 = vld [vmem:[%s1171_s0 + $0x8] sm:$0xf]  ;;  %v101_v25 = vld [vmem:[%s1171_s0 + $0xc] sm:$0xf] }
  0x11   :  { %v828_v13 = vor.u32 %v986_v11, %v825_v12  ;;  %323 = vmatpush.bf16.msra.mxu1 %v820_v9  ;;  %v799_v36 = vld [vmem:[#allocation2 + $0xc0] sm:$0xf]  ;;  %v983_v37 = vld [vmem:[#allocation2 + $0xcc] sm:$0xf0]  ;;  %v981_v38 = vld [vmem:[#allocation2 + $0xc4] sm:$0xf] }
  0x12   :  { %336 = vmatpush.bf16.msra.mxu2 %v824_v10  ;;  %v800_v39 = vor.u32 %v983_v37, %v799_v36  ;;  %v801_v40 = vld [vmem:[#allocation2 + $0xd0] sm:$0xf0]  ;;  %v807_v41 = vld [vmem:[#allocation2 + $0xc8] sm:$0xf]  ;;  %v984_v42 = vld [vmem:[#allocation2 + $0xd4] sm:$0xf0] }
  0x13   :  { %349 = vmatpush.bf16.msra.mxu3 %v828_v13  ;;  %v804_v43 = vor.u32 %v981_v38, %v801_v40  ;;  %v808_v44 = vor.u32 %v984_v42, %v807_v41  ;;  %v982_v45 = vld [vmem:[#allocation2 + $0xcc] sm:$0xf]  ;;  %v809_v46 = vld [vmem:[#allocation2 + $0xd8] sm:$0xf0]  ;;  %v783_v47 = vld [vmem:[#allocation2 + $0xa0] sm:$0xf] }
  0x14   :  { %v55_v14 = vld.sshfl [vmem:[#allocation1] sm:$0xff pattern:$0x73625140]  ;;  %v56_v15 = vld.sshfl [vmem:[#allocation1 + $0x8] sm:$0xff pattern:$0x73625140]  ;;  %311 = vmatpush.bf16.msra.mxu0 %v800_v39  ;;  %v812_v48 = vor.u32 %v982_v45, %v809_v46 }
  0x15   :  { %v60_v16 = vsel %vm59_vm0, %v55_v14, 0.0  ;;  %v61_v17 = vsel %vm59_vm0, %v56_v15, 0.0  ;;  %71 = vst [vmem:[#allocation1] ss:$4 sm:$0xff] %v69_v8  ;;  %v979_v49 = vld [vmem:[#allocation2 + $0xac] sm:$0xf0]  ;;  %324 = vmatpush.bf16.msra.mxu1 %v804_v43 }
  0x16   :  { %v62_v18 = vadd.f32 %v61_v17, %v60_v16  ;;  %v977_v50 = vld [vmem:[#allocation2 + $0xa4] sm:$0xf]  ;;  %v785_v51 = vld [vmem:[#allocation2 + $0xb0] sm:$0xf0]  ;;  %337 = vmatpush.bf16.msra.mxu2 %v808_v44  ;;  %v784_v52 = vor.u32 %v979_v49, %v783_v47  ;;  %v791_v54 = vld [vmem:[#allocation2 + $0xa8] sm:$0xf] }
  0x17   :  { %v788_v53 = vor.u32 %v977_v50, %v785_v51  ;;  %v980_v55 = vld [vmem:[#allocation2 + $0xb4] sm:$0xf0]  ;;  %v978_v56 = vld [vmem:[#allocation2 + $0xac] sm:$0xf]  ;;  %350 = vmatpush.bf16.msra.mxu3 %v812_v48  ;;  %v793_v58 = vld [vmem:[#allocation2 + $0xb8] sm:$0xf0] }
  0x18   :  { %63 = vadd.xlane.f32.xlu0 %v62_v18  ;;  %v792_v57 = vor.u32 %v980_v55, %v791_v54  ;;  %v796_v59 = vor.u32 %v978_v56, %v793_v58  ;;  %312 = vmatpush.bf16.msra.mxu0 %v784_v52  ;;  %v767_v60 = vld [vmem:[#allocation2 + $0x80] sm:$0xf]  ;;  %v975_v61 = vld [vmem:[#allocation2 + $0x8c] sm:$0xf0]  ;;  %v973_v62 = vld [vmem:[#allocation2 + $0x84] sm:$0xf] }
  0x19   :  { %325 = vmatpush.bf16.msra.mxu1 %v788_v53  ;;  %v768_v63 = vor.u32 %v975_v61, %v767_v60  ;;  %v769_v0 = vld [vmem:[#allocation2 + $0x90] sm:$0xf0]  ;;  %v775_v1 = vld [vmem:[#allocation2 + $0x88] sm:$0xf]  ;;  %v976_v2 = vld [vmem:[#allocation2 + $0x94] sm:$0xf0] }
  0x1a   :  { %338 = vmatpush.bf16.msra.mxu2 %v792_v57  ;;  %v772_v3 = vor.u32 %v973_v62, %v769_v0  ;;  %v776_v4 = vor.u32 %v976_v2, %v775_v1  ;;  %v974_v5 = vld [vmem:[#allocation2 + $0x8c] sm:$0xf]  ;;  %v777_v6 = vld [vmem:[#allocation2 + $0x98] sm:$0xf0]  ;;  %v751_v8 = vld [vmem:[#allocation2 + $0x60] sm:$0xf] }
  0x1b   :  { %351 = vmatpush.bf16.msra.mxu3 %v796_v59  ;;  %v780_v7 = vor.u32 %v974_v5, %v777_v6  ;;  %v971_v9 = vld [vmem:[#allocation2 + $0x6c] sm:$0xf0]  ;;  %v969_v10 = vld [vmem:[#allocation2 + $0x64] sm:$0xf]  ;;  %v753_v12 = vld [vmem:[#allocation2 + $0x70] sm:$0xf0]  ;;  %v50_v5 = vlaneseq }
  0x1c   :  { %v72_v20 = vld.sshfl [vmem:[#allocation1] sm:$0xff pattern:$0x73625140]  ;;  %v73_v21 = vld.sshfl [vmem:[#allocation1 + $0x8] sm:$0xff pattern:$0x73625140]  ;;  %313 = vmatpush.bf16.msra.mxu0 %v768_v63  ;;  %v752_v11 = vor.u32 %v971_v9, %v751_v8  ;;  %v756_v15 = vor.u32 %v969_v10, %v753_v12 }
  0x1d   :  { %v76_v22 = vsel %vm59_vm0, %v72_v20, 0.0  ;;  %v77_v23 = vsel %vm59_vm0, %v73_v21, 0.0  ;;  %87 = vst [vmem:[#allocation1] ss:$4 sm:$0xff] %v85_v19  ;;  %326 = vmatpush.bf16.msra.mxu1 %v772_v3  ;;  %v759_v13 = vld [vmem:[#allocation2 + $0x68] sm:$0xf] }
  0x1e   :  { %v78_v24 = vadd.f32 %v77_v23, %v76_v22  ;;  %339 = vmatpush.bf16.msra.mxu2 %v776_v4  ;;  %v972_v14 = vld [vmem:[#allocation2 + $0x74] sm:$0xf0]  ;;  %v970_v17 = vld [vmem:[#allocation2 + $0x6c] sm:$0xf]  ;;  %v761_v18 = vld [vmem:[#allocation2 + $0x78] sm:$0xf0] }
  0x1f   :  { %352 = vmatpush.bf16.msra.mxu3 %v780_v7  ;;  %v760_v16 = vor.u32 %v972_v14, %v759_v13  ;;  %v764_v19 = vor.u32 %v970_v17, %v761_v18  ;;  %v735_v20 = vld [vmem:[#allocation2 + $0x40] sm:$0xf]  ;;  %v967_v21 = vld [vmem:[#allocation2 + $0x4c] sm:$0xf0]  ;;  %v965_v22 = vld [vmem:[#allocation2 + $0x44] sm:$0xf] }
  0x20   :  { %79 = vadd.xlane.f32.xlu0 %v78_v24  ;;  %314 = vmatpush.bf16.msra.mxu0 %v752_v11  ;;  %v736_v23 = vor.u32 %v967_v21, %v735_v20  ;;  %v737_v24 = vld [vmem:[#allocation2 + $0x50] sm:$0xf0]  ;;  %v727_v37 = vld [vmem:[#allocation2 + $0x28] sm:$0xf]  ;;  %v964_v38 = vld [vmem:[#allocation2 + $0x34] sm:$0xf0] }
  0x21   :  { %327 = vmatpush.bf16.msra.mxu1 %v756_v15  ;;  %v721_v36 = vld [vmem:[#allocation2 + $0x30] sm:$0xf0]  ;;  %v728_v40 = vor.u32 %v964_v38, %v727_v37  ;;  %v962_v41 = vld [vmem:[#allocation2 + $0x2c] sm:$0xf]  ;;  %v729_v42 = vld [vmem:[#allocation2 + $0x38] sm:$0xf0] }
  0x22   :  { %340 = vmatpush.bf16.msra.mxu2 %v760_v16  ;;  %v732_v43 = vor.u32 %v962_v41, %v729_v42  ;;  %v703_v44 = vld [vmem:[#allocation2] sm:$0xf]  ;;  %v959_v45 = vld [vmem:[#allocation2 + $0xc] sm:$0xf0]  ;;  %v957_v46 = vld [vmem:[#allocation2 + $0x4] sm:$0xf] }
  0x23   :  { %353 = vmatpush.bf16.msra.mxu3 %v764_v19  ;;  %v704_v47 = vor.u32 %v959_v45, %v703_v44  ;;  %v705_v48 = vld [vmem:[#allocation2 + $0x10] sm:$0xf0]  ;;  %v711_v49 = vld [vmem:[#allocation2 + $0x8] sm:$0xf]  ;;  %v960_v50 = vld [vmem:[#allocation2 + $0x14] sm:$0xf0] }
  0x24   :  { %v88_v26 = vld.sshfl [vmem:[#allocation1] sm:$0xff pattern:$0x73625140]  ;;  %v89_v27 = vld.sshfl [vmem:[#allocation1 + $0x8] sm:$0xff pattern:$0x73625140]  ;;  %315 = vmatpush.bf16.msra.mxu0 %v736_v23  ;;  %v708_v51 = vor.u32 %v957_v46, %v705_v48  ;;  %v712_v52 = vor.u32 %v960_v50, %v711_v49 }
  0x25   :  { %v92_v28 = vsel %vm59_vm0, %v88_v26, 0.0  ;;  %v93_v29 = vsel %vm59_vm0, %v89_v27, 0.0  ;;  %103 = vst [vmem:[#allocation1] ss:$4 sm:$0xff] %v101_v25  ;;  %v743_v25 = vld [vmem:[#allocation2 + $0x48] sm:$0xf]  ;;  %v740_v27 = vor.u32 %v965_v22, %v737_v24 }
  0x26   :  { %v94_v30 = vadd.f32 %v93_v29, %v92_v28  ;;  %v968_v26 = vld [vmem:[#allocation2 + $0x54] sm:$0xf0]  ;;  %v966_v29 = vld [vmem:[#allocation2 + $0x4c] sm:$0xf]  ;;  %v713_v54 = vld [vmem:[#allocation2 + $0x18] sm:$0xf0] }
  0x27   :  { %v744_v28 = vor.u32 %v968_v26, %v743_v25  ;;  %328 = vmatpush.bf16.msra.mxu1 %v740_v27  ;;  %v958_v53 = vld [vmem:[#allocation2 + $0xc] sm:$0xf]  ;;  %v996_v56 = vld [vmem:[#allocation5 + $0x38] sm:$0xff]  ;;  %v995_v60 = vld [vmem:[#allocation5 + $0x30] sm:$0xff]  ;;  %v51_v10 = vand.u32 127, %v50_v5  ;;  %s688_s11 = sshll.u32 %s1113_s10, 4  ;;  %s689_s11 = int_to_ptr.vmem [resolvable:$true] %s688_s11 }
  0x28   :  { %95 = vadd.xlane.f32.xlu1 %v94_v30  ;;  %v745_v30 = vld [vmem:[#allocation2 + $0x58] sm:$0xf0]  ;;  %v716_v55 = vor.u32 %v958_v53, %v713_v54  ;;  %v1003_v61 = vld [vmem:[#allocation5 + $0x70] sm:$0xff]  ;;  %v994_v1 = vld [vmem:[#allocation5 + $0x28] sm:$0xff]  ;;  %s690_s14 = sshll.u32 %s1175_s4, 4  ;;  %s691_s14 = int_to_ptr.hbm [resolvable:$true] %s690_s14 }
  0x29   :  { %341 = vmatpush.bf16.msra.mxu2 %v744_v28  ;;  %v1004_v57 = vld [vmem:[#allocation5 + $0x78] sm:$0xff]  ;;  %v1011_v63 = vld [vmem:[#allocation5 + $0xb0] sm:$0xff]  ;;  %v1002_v2 = vld [vmem:[#allocation5 + $0x68] sm:$0xff]  ;;  %vm65_vm1 = vcmp.eq.s32.totalorder %v51_v10, 0  ;;  %vm81_vm2 = vcmp.eq.s32.totalorder %v51_v10, 1  ;;  %vm97_vm3 = vcmp.eq.s32.totalorder %v51_v10, 2 }
  0x2a   :  { %v1012_v58 = vld [vmem:[#allocation5 + $0xb8] sm:$0xff]  ;;  %v1019_v0 = vld [vmem:[#allocation5 + $0xf0] sm:$0xff]  ;;  %v1010_v3 = vld [vmem:[#allocation5 + $0xa8] sm:$0xff]  ;;  %vm113_vm4 = vcmp.eq.s32.totalorder %v51_v10, 3 }
  0x2b   :  { %v1020_v59 = vld [vmem:[#allocation5 + $0xf8] sm:$0xff]  ;;  %v1018_v4 = vld [vmem:[#allocation5 + $0xe8] sm:$0xff]  ;;  %v993_v6 = vld [vmem:[#allocation5 + $0x20] sm:$0xff] }
  0x2c   :  { %v104_v31 = vld.sshfl [vmem:[#allocation1] sm:$0xff pattern:$0x73625140]  ;;  %v105_v32 = vld.sshfl [vmem:[#allocation1 + $0x8] sm:$0xff pattern:$0x73625140] }
  0x2d   :  { %v108_v33 = vsel %vm59_vm0, %v104_v31, 0.0  ;;  %v109_v34 = vsel %vm59_vm0, %v105_v32, 0.0  ;;  %v748_v31 = vor.u32 %v966_v29, %v745_v30  ;;  %v719_v32 = vld [vmem:[#allocation2 + $0x20] sm:$0xf]  ;;  %342 = vmatpush.bf16.msra.mxu2 %v728_v40  ;;  %v992_v12 = vld [vmem:[#allocation5 + $0x18] sm:$0xff]  ;;  %v991_v20 = vld [vmem:[#allocation5 + $0x10] sm:$0xff] }
  0x2e   :  { %v110_v35 = vadd.f32 %v109_v34, %v108_v33  ;;  %v963_v33 = vld [vmem:[#allocation2 + $0x2c] sm:$0xf0]  ;;  %v961_v34 = vld [vmem:[#allocation2 + $0x24] sm:$0xf]  ;;  %v1000_v13 = vld [vmem:[#allocation5 + $0x58] sm:$0xff] }
  0x2f   :  { %354 = vmatpush.bf16.msra.mxu3 %v748_v31  ;;  %v724_v39 = vor.u32 %v961_v34, %v721_v36  ;;  %v1001_v7 = vld [vmem:[#allocation5 + $0x60] sm:$0xff]  ;;  %v1008_v15 = vld [vmem:[#allocation5 + $0x98] sm:$0xff]  ;;  %v999_v21 = vld [vmem:[#allocation5 + $0x50] sm:$0xff] }
  0x30   :  { %111 = vadd.xlane.f32.xlu1 %v110_v35  ;;  %v720_v35 = vor.u32 %v963_v33, %v719_v32  ;;  %v1009_v8 = vld [vmem:[#allocation5 + $0xa0] sm:$0xff]  ;;  %v1016_v16 = vld [vmem:[#allocation5 + $0xd8] sm:$0xff]  ;;  %v990_v25 = vld [vmem:[#allocation5 + $0x8] sm:$0xff] }
  0x31   :  { %329 = vmatpush.bf16.msra.mxu1 %v724_v39  ;;  %343 = vmatpush.bf16.msra.mxu2 %v712_v52  ;;  %v1017_v9 = vld [vmem:[#allocation5 + $0xe0] sm:$0xff]  ;;  %v998_v26 = vld [vmem:[#allocation5 + $0x48] sm:$0xff]  ;;  %v1007_v34 = vld [vmem:[#allocation5 + $0x90] sm:$0xff] }
  0x32   :  { %316 = vmatpush.bf16.msra.mxu0 %v720_v35  ;;  %v1015_v35 = vld [vmem:[#allocation5 + $0xd0] sm:$0xff]  ;;  %v989_v36 = vld [vmem:[#allocation5] sm:$0xff]  ;;  %v1006_v38 = vld [vmem:[#allocation5 + $0x88] sm:$0xff] }
  0x33   :  { %355 = vmatpush.bf16.msra.mxu3 %v732_v43  ;;  %v997_v37 = vld [vmem:[#allocation5 + $0x40] sm:$0xff]  ;;  %v1014_v39 = vld [vmem:[#allocation5 + $0xc8] sm:$0xff] }
  0x34   :  { %v1005_v40 = vld [vmem:[#allocation5 + $0x80] sm:$0xff] }
  0x35   :  { %330 = vmatpush.bf16.msra.mxu1 %v708_v51  ;;  %656 = vmatpush.bf16.msrb.mxu2 %v1012_v58  ;;  %v1013_v41 = vld [vmem:[#allocation5 + $0xc0] sm:$0xff] }
  0x36   :  { %317 = vmatpush.bf16.msra.mxu0 %v704_v47 }
  0x37   :  { %356 = vmatpush.bf16.msra.mxu3 %v716_v55 }
  0x39   :  { %643 = vmatpush.bf16.msrb.mxu1 %v1004_v57  ;;  %657 = vmatpush.bf16.msrb.mxu2 %v1011_v63 }
  0x3a   :  { %630 = vmatpush.bf16.msrb.mxu0 %v996_v56 }
  0x3b   :  { %669 = vmatpush.bf16.msrb.mxu3 %v1020_v59 }
  0x3d   :  { %644 = vmatpush.bf16.msrb.mxu1 %v1003_v61  ;;  %658 = vmatpush.bf16.msrb.mxu2 %v1010_v3 }
  0x3e   :  { %631 = vmatpush.bf16.msrb.mxu0 %v995_v60  ;;  %v1028_v60 = vld [vmem:[%s1174_s3] ss:$0 sm:$0xff] }
  0x3f   :  { %670 = vmatpush.bf16.msrb.mxu3 %v1019_v0 }
  0x41   :  { %645 = vmatpush.bf16.msrb.mxu1 %v1002_v2  ;;  %659 = vmatpush.bf16.msrb.mxu2 %v1009_v8 }
  0x42   :  { %632 = vmatpush.bf16.msrb.mxu0 %v994_v1 }
  0x43   :  { %671 = vmatpush.bf16.msrb.mxu3 %v1018_v4 }
  0x45   :  { %646 = vmatpush.bf16.msrb.mxu1 %v1001_v7  ;;  %660 = vmatpush.bf16.msrb.mxu2 %v1008_v15 }
  0x46   :  { %633 = vmatpush.bf16.msrb.mxu0 %v993_v6 }
  0x47   :  { %672 = vmatpush.bf16.msrb.mxu3 %v1017_v9 }
  0x49   :  { %647 = vmatpush.bf16.msrb.mxu1 %v1000_v13  ;;  %661 = vmatpush.bf16.msrb.mxu2 %v1007_v34 }
  0x4a   :  { %634 = vmatpush.bf16.msrb.mxu0 %v992_v12 }
  0x4b   :  { %673 = vmatpush.bf16.msrb.mxu3 %v1016_v16 }
  0x4d   :  { %648 = vmatpush.bf16.msrb.mxu1 %v999_v21  ;;  %662 = vmatpush.bf16.msrb.mxu2 %v1006_v38 }
  0x4e   :  { %635 = vmatpush.bf16.msrb.mxu0 %v991_v20 }
  0x4f   :  { %674 = vmatpush.bf16.msrb.mxu3 %v1015_v35 }
  0x51   :  { %649 = vmatpush.bf16.msrb.mxu1 %v998_v26  ;;  %663 = vmatpush.bf16.msrb.mxu2 %v1005_v40 }
  0x52   :  { %636 = vmatpush.bf16.msrb.mxu0 %v990_v25 }
  0x53   :  { %675 = vmatpush.bf16.msrb.mxu3 %v1014_v39 }
  0x55   :  { %650 = vmatpush.bf16.msrb.mxu1 %v997_v37 }
  0x56   :  { %637 = vmatpush.bf16.msrb.mxu0 %v989_v36 }
  0x57   :  { %676 = vmatpush.bf16.msrb.mxu3 %v1013_v41 }
  0x8b   :  { %v64_v62 = vpop.xlane.xlu0 %63 }
  0x8c   :  { %v66_v17 = vmul.f32 0.00390625, %v64_v62 }
  0x8e   :  { %v67_v22 = vsel %vm65_vm1, %v66_v17, 0.0 }
  0x93   :  { %v80_v11 = vpop.xlane.xlu0 %79 }
  0x94   :  { %v82_v18 = vmul.f32 0.00390625, %v80_v11 }
  0x96   :  { %v83_v23 = vsel %vm81_vm2, %v82_v18, 0.0 }
  0x97   :  { %v84_v27 = vadd.f32 %v83_v23, %v67_v22 }
  0x9b   :  { %v96_v14 = vpop.xlane.xlu1 %95 }
  0x9c   :  { %v98_v19 = vmul.f32 0.00390625, %v96_v14 }
  0x9e   :  { %v99_v24 = vsel %vm97_vm3, %v98_v19, 0.0 }
  0x9f   :  { %v100_v30 = vadd.f32 %v99_v24, %v84_v27 }
  0xa3   :  { %v112_v28 = vpop.xlane.xlu1 %111 }
  0xa4   :  { %v114_v29 = vmul.f32 0.00390625, %v112_v28 }
  0xa6   :  { %v115_v31 = vsel %vm113_vm4, %v114_v29, 0.0 }
  0xa7   :  { %v116_v32 = vadd.f32 %v115_v31, %v100_v30 }
  0xa9   :  { %v117_v33 = vpack.c.bf16 %v116_v32, %v116_v32 }
  0xab   :  { %318 = vmatmul.bf16.vlgmr.msra.gmra.mxu0 %v117_v33  ;;  %331 = vmatmul.bf16.vlgmr.msra.gmra.mxu1 %v117_v33 }
  0xac   :  { %344 = vmatmul.bf16.vlgmr.msra.gmra.mxu2 %v117_v33  ;;  %357 = vmatmul.bf16.vlgmr.msra.gmra.mxu3 %v117_v33 }
 0x128   :  { %v319_v42 = vpop.f32.mrf.mxu0  ;;  %v332_v43 = vpop.f32.mrf.mxu1 }
 0x129   :  { %v362_v44 = vmax.f32 %v319_v42, 0.0  ;;  %v363_v45 = vmax.f32 %v332_v43, 0.0 }
 0x12b   :  { %v366_v46 = vpack.c.bf16 %v362_v44, %v362_v44  ;;  %v367_v47 = vpack.c.bf16 %v363_v45, %v363_v45 }
 0x12d   :  { %638 = vmatmul.bf16.vlgmr.msrb.gmra.mxu0 %v366_v46  ;;  %651 = vmatmul.bf16.vlgmr.msrb.gmra.mxu1 %v367_v47 }
 0x12f   :  { %v345_v48 = vpop.f32.mrf.mxu2  ;;  %v358_v49 = vpop.f32.mrf.mxu3 }
 0x130   :  { %v364_v50 = vmax.f32 %v345_v48, 0.0  ;;  %v365_v51 = vmax.f32 %v358_v49, 0.0  ;;  %v321_v52 = vpop.f32.mrf.mxu0  ;;  %v334_v53 = vpop.f32.mrf.mxu1 }
 0x132   :  { %v368_v54 = vpack.c.bf16 %v364_v50, %v364_v50  ;;  %v369_v55 = vpack.c.bf16 %v365_v51, %v365_v51 }
 0x134   :  { %664 = vmatmul.bf16.vlgmr.msrb.gmra.mxu2 %v368_v54  ;;  %677 = vmatmul.bf16.vlgmr.msrb.gmra.mxu3 %v369_v55 }
 0x137   :  { %v347_v56 = vpop.f32.mrf.mxu2  ;;  %v360_v57 = vpop.f32.mrf.mxu3 }
 0x1aa   :  { %v639_v58 = vpop.f32.mrf.mxu0  ;;  %v652_v59 = vpop.f32.mrf.mxu1 }
 0x1ab   :  { %v640_v61 = vadd.f32 %v1028_v60, %v639_v58 }
 0x1ad   :  { %v653_v0 = vadd.f32 %v652_v59, %v640_v61 }
 0x1b2   :  { %v641_v62 = vpop.f32.mrf.mxu0  ;;  %v654_v63 = vpop.f32.mrf.mxu1 }
 0x1b7   :  { %v665_v1 = vpop.f32.mrf.mxu2  ;;  %v678_v2 = vpop.f32.mrf.mxu3 }
 0x1b8   :  { %v666_v3 = vadd.f32 %v665_v1, %v653_v0 }
 0x1ba   :  { %v679_v4 = vadd.f32 %v678_v2, %v666_v3 }
 0x1bc   :  { %682 = vst [vmem:[#allocation7] sm:$0x3] %v679_v4 }
 0x1bd   :  { %693 = dma.vmem_to_hbm [thread:$0]  %s689_s11, 32, %s691_s14, [#allocation4]  }
 0x1bf   :  { %v667_v5 = vpop.f32.mrf.mxu2  ;;  %v680_v6 = vpop.f32.mrf.mxu3 }
 0x1c0   :  { %1105 = dma.done.wait [#allocation4], 32  }
 0x1c1   :  { %1106 = vsyncadd [#allocation4], 4294967264 }
 0x1c2   :  { %698 = vsyncpa [#allocation3], 1 }
 0x1c3   :  { %699 = vsyncpa [#allocation6], 1 }
 0x1c4   :  { %700 = vsyncpa [#allocation4], 1 }

</bundles_post_ra>
